<compile_context>
chip_gen: v7x
topology: tpu7x:2x2x1
jax: 0.10.0
libtpu: 0.0.40
codegen_flags: <defaults>
</compile_context>

<pallas_src>
import jax
import jax.numpy as jnp
from jax.experimental import pallas as pl
from jax.experimental.pallas import tpu as pltpu

_LANES = 128
_MAX_ROW_TILE = 1024


# ----------------------------- kernel -------------------------------------- #

def _coord_loss_kernel(out_ref, gt_ref, mask_ref, loss_ref):
    """loss = |out - gt| * mask  (mask already folds valid and the z-scale)."""
    loss_ref[...] = (
        jnp.abs(out_ref[...] - gt_ref[...]) * mask_ref[...]
    ).astype(loss_ref.dtype)


# ----------------------------- launch helpers ------------------------------ #

def _cdiv(a, b):
    return -(-a // b)


def _row_tile(rows, dtype):
    """Row-tile size: whole array if it fits one grid step, else balanced tiles."""
    if rows <= _MAX_ROW_TILE:
        return rows                                  # block == full dim: legal
    sub = 16 if jnp.dtype(dtype).itemsize == 2 else 8
    n_blocks = _cdiv(rows, _MAX_ROW_TILE)
    return _cdiv(_cdiv(rows, n_blocks), sub) * sub   # balanced, sublane-aligned


def _launch(streams, out_dtype):
    rows = streams[0].shape[0]
    tb = _row_tile(rows, out_dtype)
    spec = pl.BlockSpec((tb, _LANES), lambda i: (i, 0))
    return pl.pallas_call(
        _coord_loss_kernel,
        out_shape=jax.ShapeDtypeStruct((rows, _LANES), out_dtype),
        grid=(_cdiv(rows, tb),),
        in_specs=[spec] * len(streams),
        out_specs=spec,
        # TODO(synk): try CompilerParams(allow_input_fusion=...) so the mask's
        # broadcast/where producer fuses into the pallas_call input pipeline
        # (must be verified in HLO on real hardware).
        compiler_params=pltpu.CompilerParams(
            dimension_semantics=("parallel",)),
    )(*streams)


def _make_mask(shape, dtype, valid, is_3d):
    """Combined multiplier: broadcast(valid) * (is_3D on channels >= 2 else 1)."""
    mask = jnp.broadcast_to(valid, shape).astype(dtype)
    if is_3d is not None:
        B, _, C = shape
        chan = jax.lax.broadcasted_iota(jnp.int32, (1, 1, C), 2)
        zscale = jnp.where(chan >= 2,
                           is_3d.astype(dtype).reshape(B, 1, 1),
                           jnp.asarray(1, dtype))            # (B, 1, C)
        mask = mask * zscale
    return mask


def _coord_loss_impl(coord_out, coord_gt, valid, is_3d):
    shape = coord_out.shape
    dtype = coord_out.dtype
    mask = _make_mask(shape, dtype, valid, is_3d)

    n = coord_out.size
    n_main = (n // _LANES) * _LANES                  # 128-aligned prefix

    flat_out = coord_out.reshape(-1)                 # row-major reshape: free
    flat_gt = coord_gt.reshape(-1)
    flat_mask = mask.reshape(-1)

    parts = []
    if n_main > 0:                                   # static under jit
        rows = n_main // _LANES
        a = flat_out[:n_main].reshape(rows, _LANES)
        b = flat_gt[:n_main].reshape(rows, _LANES)
        m = flat_mask[:n_main].reshape(rows, _LANES)
        parts.append(_launch((a, b, m), dtype).reshape(-1))
    if n_main < n:                                   # <=127-element tail: XLA
        tail = (jnp.abs(flat_out[n_main:] - flat_gt[n_main:])
                * flat_mask[n_main:]).astype(dtype)
        parts.append(tail)
    flat_loss = parts[0] if len(parts) == 1 else jnp.concatenate(parts)
    return flat_loss.reshape(shape)


@jax.jit
def _coord_loss_no3d(coord_out, coord_gt, valid):
    return _coord_loss_impl(coord_out, coord_gt, valid, None)


@jax.jit
def _coord_loss_3d(coord_out, coord_gt, valid, is_3d):
    return _coord_loss_impl(coord_out, coord_gt, valid, is_3d)


def coord_loss(coord_out, coord_gt, valid, is_3D=None):
    """Pallas-backed equivalent of CoordLoss.forward."""
    if is_3D is None:
        return _coord_loss_no3d(coord_out, coord_gt, valid)
    return _coord_loss_3d(coord_out, coord_gt, valid, is_3D)


# ----------------------------- reference + test ----------------------------- #

def _reference(coord_out, coord_gt, valid, is_3D=None):
    loss = jnp.abs(coord_out - coord_gt) * valid
    if is_3D is not None:
        loss_z = loss[:, :, 2:] * is_3D[:, None, None].astype(loss.dtype)
        loss = jnp.concatenate((loss[:, :, :2], loss_z), axis=2)
    return loss.astype(coord_out.dtype)


if __name__ == "__main__":
    key = jax.random.PRNGKey(0)
    k1, k2, k3, k4 = jax.random.split(key, 4)

    # Case 1: ragged flat size (2*22*3 = 132) -> 128-elem prefix runs the
    # kernel, 4-elem tail handled by XLA (no jnp.pad copies).
    B, J, C = 2, 22, 3
    coord_out = jax.random.normal(k1, (B, J, C), dtype=jnp.float32)
    coord_gt = jax.random.normal(k2, (B, J, C), dtype=jnp.float32)
    valid = (jax.random.uniform(k3, (B, J, C)) > 0.3).astype(jnp.float32)
    is_3D = (jax.random.uniform(k4, (B,)) > 0.5).astype(jnp.float32)

    out = jax.block_until_ready(coord_loss(coord_out, coord_gt, valid, is_3D))
    ref = _reference(coord_out, coord_gt, valid, is_3D)
    assert out.shape == ref.shape and jnp.allclose(out, ref, atol=1e-6), \
        "mismatch (is_3D path, ragged)"

    out2 = jax.block_until_ready(coord_loss(coord_out, coord_gt, valid, None))
    ref2 = _reference(coord_out, coord_gt, valid, None)
    assert jnp.allclose(out2, ref2, atol=1e-6), "mismatch (no-is_3D path)"

    # Case 2: 128-divisible flat size (4*32*3 = 384) with broadcastable
    # (B, J, 1) valid -- copy-free lane-dense path, kernel only.
    k5, k6, k7, k8 = jax.random.split(jax.random.PRNGKey(1), 4)
    B2, J2 = 4, 32
    co2 = jax.random.normal(k5, (B2, J2, 3), dtype=jnp.float32)
    cg2 = jax.random.normal(k6, (B2, J2, 3), dtype=jnp.float32)
    va2 = (jax.random.uniform(k7, (B2, J2, 1)) > 0.3).astype(jnp.float32)
    i32 = (jax.random.uniform(k8, (B2,)) > 0.5).astype(jnp.float32)

    out3 = jax.block_until_ready(coord_loss(co2, cg2, va2, i32))
    ref3 = _reference(co2, cg2, va2, i32)
    assert jnp.allclose(out3, ref3, atol=1e-6), "mismatch (broadcast-valid path)"

    # Case 3: bf16 coordinates -- the mask stream runs in bf16 as well.
    co3 = co2.astype(jnp.bfloat16)
    cg3 = cg2.astype(jnp.bfloat16)
    out4 = jax.block_until_ready(coord_loss(co3, cg3, va2, i32))
    ref4 = _reference(co3, cg3, va2, i32)
    assert out4.dtype == jnp.bfloat16 and jnp.allclose(
        out4.astype(jnp.float32), ref4.astype(jnp.float32), atol=1e-2), \
        "mismatch (bf16 path)"

    print("KERNEL_OK")
</pallas_src>

<mosaic_0001>
module attributes {stable_mosaic.version = 11 : i64} {
  func.func @_coord_loss_kernel(%arg0: i32, %arg1: memref<1x128xf32, #tpu.memory_space<vmem>>, %arg2: memref<1x128xf32, #tpu.memory_space<vmem>>, %arg3: memref<1x128xf32, #tpu.memory_space<vmem>>, %arg4: memref<1x128xf32, #tpu.memory_space<vmem>>) attributes {dimension_semantics = [#tpu.dimension_semantics<parallel>], iteration_bounds = array<i64: 1>, scalar_prefetch = 0 : i64, scratch_operands = 0 : i64, tpu.core_type = #tpu.core_type<tc>, window_params = [{transform_indices = @transform_0, window_bounds = array<i64: 1, 128>}, {transform_indices = @transform_1, window_bounds = array<i64: 1, 128>}, {transform_indices = @transform_2, window_bounds = array<i64: 1, 128>}, {transform_indices = @transform_3, window_bounds = array<i64: 1, 128>}]} {
    %c0 = arith.constant 0 : index
    %c0_0 = arith.constant 0 : index
    %0 = vector.load %arg1[%c0, %c0_0] : memref<1x128xf32, #tpu.memory_space<vmem>>, vector<1x128xf32>
    %c0_1 = arith.constant 0 : index
    %c0_2 = arith.constant 0 : index
    %1 = vector.load %arg2[%c0_1, %c0_2] : memref<1x128xf32, #tpu.memory_space<vmem>>, vector<1x128xf32>
    %2 = arith.subf %0, %1 : vector<1x128xf32>
    %3 = math.absf %2 : vector<1x128xf32>
    %c0_3 = arith.constant 0 : index
    %c0_4 = arith.constant 0 : index
    %4 = vector.load %arg3[%c0_3, %c0_4] : memref<1x128xf32, #tpu.memory_space<vmem>>, vector<1x128xf32>
    %5 = arith.mulf %3, %4 : vector<1x128xf32>
    %c0_5 = arith.constant 0 : index
    %c0_6 = arith.constant 0 : index
    %6 = vector.load %arg4[%c0_5, %c0_6] : memref<1x128xf32, #tpu.memory_space<vmem>>, vector<1x128xf32>
    tpu.vector_store %arg4[%c0_5, %c0_6], %5 {strides = array<i32>} : memref<1x128xf32, #tpu.memory_space<vmem>>, vector<1x128xf32>,
    return
  }
  func.func @transform_0(%arg0: i32) -> (i32, i32) {
    %c0_i32 = arith.constant 0 : i32
    %c0_i32_0 = arith.constant 0 : i32
    return %arg0, %c0_i32 : i32, i32
  }
  func.func @transform_1(%arg0: i32) -> (i32, i32) {
    %c0_i32 = arith.constant 0 : i32
    %c0_i32_0 = arith.constant 0 : i32
    return %arg0, %c0_i32 : i32, i32
  }
  func.func @transform_2(%arg0: i32) -> (i32, i32) {
    %c0_i32 = arith.constant 0 : i32
    %c0_i32_0 = arith.constant 0 : i32
    return %arg0, %c0_i32 : i32, i32
  }
  func.func @transform_3(%arg0: i32) -> (i32, i32) {
    %c0_i32 = arith.constant 0 : i32
    %c0_i32_0 = arith.constant 0 : i32
    return %arg0, %c0_i32 : i32, i32
  }
}

</mosaic_0001>

<bundles_post_ra>
// kernel: _coord_loss_3d.1
= control target key start
LH: loop header
LB: loop body
LE: loop exit
PB: predicated region body
PF: predicated region fallthrough
CT: control target
= control target key end

     0   :  { %s57_s0 = inlined_call_operand.vmem [shape: f32[1,128], index: 0, kind: input, shape index: {}]   ;;  %s58_s1 = inlined_call_operand.vmem [shape: f32[1,128], index: 1, kind: input, shape index: {}]   ;;  %s59_s2 = inlined_call_operand.vmem [shape: f32[1,128], index: 2, kind: input, shape index: {}]   ;;  %s60_s3 = inlined_call_operand.vmem [shape: f32[1,128], index: 3, kind: output, shape index: {}]  }
   0x1   :  { %v14_v0 = vld [vmem:[%s57_s0] sm:$0x1] }
   0x2   :  { %v15_v1 = vld [vmem:[%s58_s1] sm:$0x1] }
   0x3   :  { %v16_v2 = vsub.f32 %v14_v0, %v15_v1  ;;  %v18_v3 = vld [vmem:[%s59_s2] sm:$0x1] }
   0x5   :  { %v17_v4 = vand.u32 2147483647, %v16_v2 }
   0x7   :  { %v19_v5 = vmul.f32 %v18_v3, %v17_v4 }
   0x9   :  { %20 = vst [vmem:[%s60_s3] sm:$0x1] %v19_v5 }

</bundles_post_ra>
